<compile_context>
chip_gen: v5e
topology: v5e:2x2
jax: 0.10.0
libtpu: 0.0.40
codegen_flags: <defaults>
</compile_context>

<pallas_src>
import functools

import jax
import jax.numpy as jnp
from jax.experimental import pallas as pl
from jax.experimental.pallas import tpu as pltpu

_LANES = 128
_SUBLANES = 8
_NEG_BIG = -1e30  # bias for padded softmax lanes: exp() underflows to exactly 0


def _round_up(n, m):
    return ((n + m - 1) // m) * m


def _discriminator_kernel(x_ref, w1_ref, b1_ref, w2_ref, b2_ref,
                          w3_ref, b3_ref, o_ref):
    # f32 -> bf16 cast happens *inside* the kernel so the wrapper never makes
    # an extra HBM pass over x; the cast is cheap VPU work hidden under MXU.
    x = x_ref[...].astype(jnp.bfloat16)                       # (TB, D_in)

    # layer 1: Linear + ReLU (bf16 MXU operands, f32 accumulate, f32 bias/ReLU)
    h1 = jnp.dot(x, w1_ref[...].astype(jnp.bfloat16),
                 preferred_element_type=jnp.float32)
    h1 = jnp.maximum(h1 + b1_ref[...], 0.0)                   # (TB, H) f32

    # layer 2: Linear + ReLU
    h2 = jnp.dot(h1.astype(jnp.bfloat16), w2_ref[...].astype(jnp.bfloat16),
                 preferred_element_type=jnp.float32)
    h2 = jnp.maximum(h2 + b2_ref[...], 0.0)                   # (TB, H) f32

    # layer 3: Linear. The output width is padded to a lane-dense 128-multiple;
    # padded columns get a -1e30 bias so they drop out of the softmax.
    logits = jnp.dot(h2.astype(jnp.bfloat16), w3_ref[...].astype(jnp.bfloat16),
                     preferred_element_type=jnp.float32)
    logits = logits + b3_ref[...]                              # (TB, D_out_p) f32

    # Softmax over features (matches nn.Softmax() -> dim=1 for 2-D input).
    m = jnp.max(logits, axis=-1, keepdims=True)
    e = jnp.exp(logits - m)
    denom = jnp.sum(e, axis=-1, keepdims=True)
    # Exact divide (not approx reciprocal) so rows normalize exactly.
    o_ref[...] = (e / denom).astype(o_ref.dtype)


def _estimate_vmem_bytes(tb, d_in, h, d_out_p):
    """Rough VMEM footprint for one batch tile (used to cap tb)."""
    lane = lambda n: _round_up(n, _LANES)
    sub = lambda n: _round_up(n, _SUBLANES)
    x_buf = 2 * tb * lane(d_in) * 4                  # streamed x tiles (f32, 2 bufs)
    o_buf = 2 * tb * lane(d_out_p) * 4               # streamed out tiles (f32, 2 bufs)
    w_buf = 2 * 4 * (sub(d_in) * lane(h)             # weights: constant index_map
                     + sub(h) * lane(h)              # (fetched once) but the pipeline
                     + sub(h) * lane(d_out_p))       # still allocates 2 buffers each
    b_buf = 2 * 4 * 3 * _SUBLANES * _LANES           # 3 biases, (8,128)-padded
    tmp = (tb * lane(h) * (4 + 2) * 2                # h1/h2 f32 + bf16 copies
           + tb * lane(d_out_p) * 4 * 2              # logits / e
           + tb * lane(d_in) * 2)                    # bf16 copy of x
    return x_buf + o_buf + w_buf + b_buf + tmp


@functools.partial(jax.jit, static_argnames=("block_b",))
def discriminator_forward(x, params, *, block_b=1024):
    """x: (B, D_in) float32. params: dict of w1,b1,w2,b2,w3,b3 (all float32;
    weights stored (in_features, out_features); biases stored (1, out_features)).

    Returns softmax probabilities (B, D_out) in float32.
    """
    w1, b1 = params["w1"], params["b1"]
    w2, b2 = params["w2"], params["b2"]
    w3, b3 = params["w3"], params["b3"]

    B, D_in = x.shape
    H = w1.shape[1]
    D_out = w3.shape[1]

    # Lane-dense output: pad the last layer to a 128-lane multiple.  Padded
    # logit columns carry a -1e30 bias -> exp() == 0 -> they contribute nothing
    # to the softmax; the wrapper slices them off.  (w3/b3 pads are tiny.)
    D_out_p = _round_up(D_out, _LANES)
    if D_out_p != D_out:
        w3 = jnp.pad(w3, ((0, 0), (0, D_out_p - D_out)))
        b3 = jnp.pad(b3, ((0, 0), (0, D_out_p - D_out)), constant_values=_NEG_BIG)

    # Batch tile: multiple of 16 sublanes (bf16 packs (16,128) per vreg),
    # capped so (a) there are >= 2 grid tiles whenever B >= 32 so the
    # "parallel" batch axis can shard across v7x's two TensorCores, and
    # (b) the streamed tiles + resident weights + temporaries stay within a
    # 32 MiB VMEM budget (safe on every generation incl. v7x's 64 MiB/TC).
    tb = min(block_b, _round_up(B, 16))
    if B >= 2 * 16:
        tb = min(tb, _round_up(pl.cdiv(B, 2), 16))   # at least 2 grid tiles
    tb = max(16, (tb // 16) * 16)
    vmem_budget = 32 * 1024 * 1024
    while tb > 16 and _estimate_vmem_bytes(tb, D_in, H, D_out_p) > vmem_budget:
        tb = max(16, ((tb // 2) // 16) * 16)
    if tb > _round_up(B, _SUBLANES):                 # tiny batches: 8-row tile
        tb = _round_up(B, _SUBLANES)
    n_tiles = pl.cdiv(B, tb)                         # ragged tail masked by Pallas

    # Weights/biases: constant index_map -> fetched once, VMEM-resident across
    # the whole batch grid (no re-DMA per tile).
    const2d = lambda a: pl.BlockSpec(a.shape, lambda i: (0, 0))

    out = pl.pallas_call(
        _discriminator_kernel,
        out_shape=jax.ShapeDtypeStruct((B, D_out_p), jnp.float32),
        grid=(n_tiles,),
        in_specs=[
            pl.BlockSpec((tb, D_in), lambda i: (i, 0)),   # x: streamed over batch
            const2d(w1), const2d(b1),
            const2d(w2), const2d(b2),
            const2d(w3), const2d(b3),
        ],
        out_specs=pl.BlockSpec((tb, D_out_p), lambda i: (i, 0)),
        compiler_params=pltpu.CompilerParams(
            # batch axis is embarrassingly parallel -> megacore on v7x.
            dimension_semantics=("parallel",),
            # explicit limit: v5e's scoped default is only 16 MiB; 64 MiB is
            # within physical VMEM on every generation and well above the
            # ~32 MiB budget used to size tb.
            vmem_limit_bytes=64 * 1024 * 1024,
        ),
    )(x, w1, b1, w2, b2, w3, b3)

    return out[:, :D_out]


def init_params(key, input_dims, hidden_dims, output_dims):
    """Deterministic init mirroring PyTorch Linear default (U[-1/sqrt(fan_in), +])."""
    ks = jax.random.split(key, 6)

    def lin(kw, kb, fan_in, fan_out):
        bound = 1.0 / jnp.sqrt(jnp.float32(fan_in))
        w = jax.random.uniform(kw, (fan_in, fan_out), jnp.float32, -bound, bound)
        b = jax.random.uniform(kb, (1, fan_out), jnp.float32, -bound, bound)
        return w, b

    w1, b1 = lin(ks[0], ks[1], input_dims, hidden_dims)
    w2, b2 = lin(ks[2], ks[3], hidden_dims, hidden_dims)
    w3, b3 = lin(ks[4], ks[5], hidden_dims, output_dims)
    return {"w1": w1, "b1": b1, "w2": w2, "b2": b2, "w3": w3, "b3": b3}


def _reference_f32(x, p):
    h1 = jnp.maximum(x @ p["w1"] + p["b1"], 0.0)
    h2 = jnp.maximum(h1 @ p["w2"] + p["b2"], 0.0)
    return jax.nn.softmax(h2 @ p["w3"] + p["b3"], axis=-1)


if __name__ == "__main__":
    key = jax.random.PRNGKey(0)
    k_x, k_x2, k_p = jax.random.split(key, 3)

    batch, input_dims, hidden_dims, output_dims = 8, 32, 32, 4
    params = init_params(k_p, input_dims, hidden_dims, output_dims)

    # Small batch (single tile).
    x = jax.random.normal(k_x, (batch, input_dims), jnp.float32)
    out = jax.block_until_ready(discriminator_forward(x, params))
    ref = _reference_f32(x, params)
    assert out.shape == (batch, output_dims)
    # bf16 MXU operands -> compare loosely vs. the f32 reference.
    assert jnp.allclose(out, ref, atol=3e-2, rtol=3e-2), (
        f"max abs err {jnp.max(jnp.abs(out - ref))}")
    # exact-divide softmax: rows sum to 1 and probabilities stay in [0, 1]
    assert jnp.allclose(jnp.sum(out, axis=-1), jnp.ones((batch,)), atol=1e-3)
    assert bool(jnp.all(out >= 0.0)) and bool(jnp.all(out <= 1.0 + 1e-6))

    # Ragged batch (2 grid tiles, masked partial last tile) exercises the grid path.
    x2 = jax.random.normal(k_x2, (40, input_dims), jnp.float32)
    out2 = jax.block_until_ready(discriminator_forward(x2, params))
    ref2 = _reference_f32(x2, params)
    assert out2.shape == (40, output_dims)
    assert jnp.allclose(out2, ref2, atol=3e-2, rtol=3e-2), (
        f"max abs err {jnp.max(jnp.abs(out2 - ref2))}")

    print("KERNEL_OK")
</pallas_src>

<mosaic_0001>
module attributes {stable_mosaic.version = 11 : i64} {
  func.func @_discriminator_kernel(%arg0: i32, %arg1: memref<8x32xf32, #tpu.memory_space<vmem>>, %arg2: memref<32x32xf32, #tpu.memory_space<vmem>>, %arg3: memref<1x32xf32, #tpu.memory_space<vmem>>, %arg4: memref<32x32xf32, #tpu.memory_space<vmem>>, %arg5: memref<1x32xf32, #tpu.memory_space<vmem>>, %arg6: memref<32x128xf32, #tpu.memory_space<vmem>>, %arg7: memref<1x128xf32, #tpu.memory_space<vmem>>, %arg8: memref<8x128xf32, #tpu.memory_space<vmem>>) attributes {dimension_semantics = [#tpu.dimension_semantics<parallel>], iteration_bounds = array<i64: 1>, scalar_prefetch = 0 : i64, scratch_operands = 0 : i64, tpu.core_type = #tpu.core_type<tc>, window_params = [{transform_indices = @transform_0, window_bounds = array<i64: 8, 32>}, {pipeline_mode = #tpu.pipeline_mode<synchronous>, transform_indices = @transform_1, window_bounds = array<i64: 32, 32>}, {pipeline_mode = #tpu.pipeline_mode<synchronous>, transform_indices = @transform_2, window_bounds = array<i64: 1, 32>}, {pipeline_mode = #tpu.pipeline_mode<synchronous>, transform_indices = @transform_3, window_bounds = array<i64: 32, 32>}, {pipeline_mode = #tpu.pipeline_mode<synchronous>, transform_indices = @transform_4, window_bounds = array<i64: 1, 32>}, {pipeline_mode = #tpu.pipeline_mode<synchronous>, transform_indices = @transform_5, window_bounds = array<i64: 32, 128>}, {pipeline_mode = #tpu.pipeline_mode<synchronous>, transform_indices = @transform_6, window_bounds = array<i64: 1, 128>}, {transform_indices = @transform_7, window_bounds = array<i64: 8, 128>}]} {
    %c0 = arith.constant 0 : index
    %c0_0 = arith.constant 0 : index
    %0 = vector.load %arg1[%c0, %c0_0] : memref<8x32xf32, #tpu.memory_space<vmem>>, vector<8x32xf32>
    %1 = arith.truncf %0 : vector<8x32xf32> to vector<8x32xbf16>
    %c0_1 = arith.constant 0 : index
    %c0_2 = arith.constant 0 : index
    %2 = vector.load %arg2[%c0_1, %c0_2] : memref<32x32xf32, #tpu.memory_space<vmem>>, vector<32x32xf32>
    %3 = arith.truncf %2 : vector<32x32xf32> to vector<32x32xbf16>
    %cst = arith.constant dense<0.000000e+00> : vector<8x32xf32>
    %4 = tpu.matmul %1, %3, %cst {dimension_numbers = #tpu.dot_dimension_numbers<[1], [0], [0], [1], [0, 0, 1, 1], [], []>} : vector<8x32xbf16>, vector<32x32xbf16>, vector<8x32xf32> -> vector<8x32xf32>
    %c0_3 = arith.constant 0 : index
    %c0_4 = arith.constant 0 : index
    %5 = vector.load %arg3[%c0_3, %c0_4] : memref<1x32xf32, #tpu.memory_space<vmem>>, vector<1x32xf32>
    %6 = vector.broadcast %5 : vector<1x32xf32> to vector<8x32xf32>
    %7 = arith.addf %4, %6 : vector<8x32xf32>
    %cst_5 = arith.constant 0.000000e+00 : f32
    %8 = vector.broadcast %cst_5 : f32 to vector<8x32xf32>
    %9 = arith.maximumf %7, %8 : vector<8x32xf32>
    %10 = arith.truncf %9 : vector<8x32xf32> to vector<8x32xbf16>
    %c0_6 = arith.constant 0 : index
    %c0_7 = arith.constant 0 : index
    %11 = vector.load %arg4[%c0_6, %c0_7] : memref<32x32xf32, #tpu.memory_space<vmem>>, vector<32x32xf32>
    %12 = arith.truncf %11 : vector<32x32xf32> to vector<32x32xbf16>
    %cst_8 = arith.constant dense<0.000000e+00> : vector<8x32xf32>
    %13 = tpu.matmul %10, %12, %cst_8 {dimension_numbers = #tpu.dot_dimension_numbers<[1], [0], [0], [1], [0, 0, 1, 1], [], []>} : vector<8x32xbf16>, vector<32x32xbf16>, vector<8x32xf32> -> vector<8x32xf32>
    %c0_9 = arith.constant 0 : index
    %c0_10 = arith.constant 0 : index
    %14 = vector.load %arg5[%c0_9, %c0_10] : memref<1x32xf32, #tpu.memory_space<vmem>>, vector<1x32xf32>
    %15 = vector.broadcast %14 : vector<1x32xf32> to vector<8x32xf32>
    %16 = arith.addf %13, %15 : vector<8x32xf32>
    %cst_11 = arith.constant 0.000000e+00 : f32
    %17 = vector.broadcast %cst_11 : f32 to vector<8x32xf32>
    %18 = arith.maximumf %16, %17 : vector<8x32xf32>
    %19 = arith.truncf %18 : vector<8x32xf32> to vector<8x32xbf16>
    %c0_12 = arith.constant 0 : index
    %c0_13 = arith.constant 0 : index
    %20 = vector.load %arg6[%c0_12, %c0_13] : memref<32x128xf32, #tpu.memory_space<vmem>>, vector<32x128xf32>
    %21 = arith.truncf %20 : vector<32x128xf32> to vector<32x128xbf16>
    %cst_14 = arith.constant dense<0.000000e+00> : vector<8x128xf32>
    %22 = tpu.matmul %19, %21, %cst_14 {dimension_numbers = #tpu.dot_dimension_numbers<[1], [0], [0], [1], [0, 0, 1, 1], [], []>} : vector<8x32xbf16>, vector<32x128xbf16>, vector<8x128xf32> -> vector<8x128xf32>
    %c0_15 = arith.constant 0 : index
    %c0_16 = arith.constant 0 : index
    %23 = vector.load %arg7[%c0_15, %c0_16] : memref<1x128xf32, #tpu.memory_space<vmem>>, vector<1x128xf32>
    %24 = vector.broadcast %23 : vector<1x128xf32> to vector<8x128xf32>
    %25 = arith.addf %22, %24 : vector<8x128xf32>
    %cst_17 = arith.constant dense<0xFF800000> : vector<8xf32>
    %26 = vector.multi_reduction <maximumf>, %25, %cst_17 [1] : vector<8x128xf32> to vector<8xf32>
    %27 = vector.shape_cast %26 : vector<8xf32> to vector<8x1xf32>
    %28 = vector.broadcast %27 : vector<8x1xf32> to vector<8x128xf32>
    %29 = arith.subf %25, %28 : vector<8x128xf32>
    %30 = math.exp %29 : vector<8x128xf32>
    %cst_18 = arith.constant dense<0.000000e+00> : vector<8xf32>
    %31 = vector.multi_reduction <add>, %30, %cst_18 [1] : vector<8x128xf32> to vector<8xf32>
    %32 = vector.shape_cast %31 : vector<8xf32> to vector<8x1xf32>
    %33 = vector.broadcast %32 : vector<8x1xf32> to vector<8x128xf32>
    %34 = arith.divf %30, %33 : vector<8x128xf32>
    %c0_19 = arith.constant 0 : index
    %c0_20 = arith.constant 0 : index
    %35 = vector.load %arg8[%c0_19, %c0_20] : memref<8x128xf32, #tpu.memory_space<vmem>>, vector<8x128xf32>
    tpu.vector_store %arg8[%c0_19, %c0_20], %34 {strides = array<i32>} : memref<8x128xf32, #tpu.memory_space<vmem>>, vector<8x128xf32>,
    return
  }
  func.func @transform_0(%arg0: i32) -> (i32, i32) {
    %c0_i32 = arith.constant 0 : i32
    %c0_i32_0 = arith.constant 0 : i32
    return %arg0, %c0_i32 : i32, i32
  }
  func.func @transform_1(%arg0: i32) -> (i32, i32) {
    %c0_i32 = arith.constant 0 : i32
    %c0_i32_0 = arith.constant 0 : i32
    %c0_i32_1 = arith.constant 0 : i32
    return %c0_i32, %c0_i32_0 : i32, i32
  }
  func.func @transform_2(%arg0: i32) -> (i32, i32) {
    %c0_i32 = arith.constant 0 : i32
    %c0_i32_0 = arith.constant 0 : i32
    %c0_i32_1 = arith.constant 0 : i32
    return %c0_i32, %c0_i32_0 : i32, i32
  }
  func.func @transform_3(%arg0: i32) -> (i32, i32) {
    %c0_i32 = arith.constant 0 : i32
    %c0_i32_0 = arith.constant 0 : i32
    %c0_i32_1 = arith.constant 0 : i32
    return %c0_i32, %c0_i32_0 : i32, i32
  }
  func.func @transform_4(%arg0: i32) -> (i32, i32) {
    %c0_i32 = arith.constant 0 : i32
    %c0_i32_0 = arith.constant 0 : i32
    %c0_i32_1 = arith.constant 0 : i32
    return %c0_i32, %c0_i32_0 : i32, i32
  }
  func.func @transform_5(%arg0: i32) -> (i32, i32) {
    %c0_i32 = arith.constant 0 : i32
    %c0_i32_0 = arith.constant 0 : i32
    %c0_i32_1 = arith.constant 0 : i32
    return %c0_i32, %c0_i32_0 : i32, i32
  }
  func.func @transform_6(%arg0: i32) -> (i32, i32) {
    %c0_i32 = arith.constant 0 : i32
    %c0_i32_0 = arith.constant 0 : i32
    %c0_i32_1 = arith.constant 0 : i32
    return %c0_i32, %c0_i32_0 : i32, i32
  }
  func.func @transform_7(%arg0: i32) -> (i32, i32) {
    %c0_i32 = arith.constant 0 : i32
    %c0_i32_0 = arith.constant 0 : i32
    return %arg0, %c0_i32 : i32, i32
  }
}

</mosaic_0001>

<bundles_post_ra>
// kernel: discriminator_forward.1
= control target key start
LH: loop header
LB: loop body
LE: loop exit
PB: predicated region body
PF: predicated region fallthrough
CT: control target
= control target key end

     0   :  { %vm39_vm0 = vcmask 261120   ;;  %s243_s1 = inlined_call_operand.vmem [shape: f32[32,32], index: 1, kind: input, shape index: {}]   ;;  %s244_s0 = inlined_call_operand.vmem [shape: f32[8,32], index: 0, kind: input, shape index: {}]   ;;  %s245_s2 = inlined_call_operand.vmem [shape: f32[1,32], index: 2, kind: input, shape index: {}]   ;;  %s246_s4 = inlined_call_operand.vmem [shape: f32[1,32], index: 4, kind: input, shape index: {}]   ;;  %s247_s3 = inlined_call_operand.vmem [shape: f32[32,32], index: 3, kind: input, shape index: {}]   ;;  %s248_s6 = inlined_call_operand.vmem [shape: f32[1,128], index: 6, kind: input, shape index: {}]   ;;  %s249_s5 = inlined_call_operand.vmem [shape: f32[32,128], index: 5, kind: input, shape index: {}]   ;;  %s250_s7 = inlined_call_operand.vmem [shape: f32[8,128], index: 7, kind: output, shape index: {}]  }
   0x1   :  { %v31_v0 = vld [vmem:[%s243_s1 + $0x10] sm:$0xff]  ;;  %v32_v1 = vld [vmem:[%s243_s1 + $0x18] sm:$0xff]  ;;  %v29_v2 = vld [vmem:[%s243_s1] sm:$0xff] }
   0x2   :  { %v34_v3 = vpack.c.bf16 %v32_v1, %v31_v0  ;;  %v30_v4 = vld [vmem:[%s243_s1 + $0x8] sm:$0xff]  ;;  %v27_v6 = vld [vmem:[%s244_s0] sm:$0xff]  ;;  %v60_v8 = vld [vmem:[%s247_s3 + $0x10] sm:$0xff] }
   0x3   :  { %v33_v5 = vpack.c.bf16 %v30_v4, %v29_v2  ;;  %v28_v7 = vpack.c.bf16 %v27_v6, %v27_v6  ;;  %v61_v9 = vld [vmem:[%s247_s3 + $0x18] sm:$0xff]  ;;  %v58_v11 = vld [vmem:[%s247_s3] sm:$0xff]  ;;  %v59_v12 = vld [vmem:[%s247_s3 + $0x8] sm:$0xff] }
   0x4   :  { %49 = vmatpush.bf16.msra.mxu0 %v34_v3  ;;  %v63_v10 = vpack.c.bf16 %v61_v9, %v60_v8  ;;  %v62_v13 = vpack.c.bf16 %v59_v12, %v58_v11  ;;  %v142_v14 = vld [vmem:[%s245_s2] ss:$0 sm:$0xff]  ;;  %v88_v20 = vld [vmem:[%s249_s5 + $0x10] sm:$0xff]  ;;  %v89_v21 = vld [vmem:[%s249_s5 + $0x18] sm:$0xff] }
   0x5   :  { %v91_v22 = vpack.c.bf16 %v89_v21, %v88_v20  ;;  %v86_v23 = vld [vmem:[%s249_s5] sm:$0xff]  ;;  %v87_v24 = vld [vmem:[%s249_s5 + $0x8] sm:$0xff] }
   0x6   :  { %77 = vmatpush.bf16.msra.mxu1 %v63_v10  ;;  %v90_v25 = vpack.c.bf16 %v87_v24, %v86_v23  ;;  %v143_v26 = vld [vmem:[%s246_s4] ss:$0 sm:$0xff] }
   0x7   :  { %105 = vmatpush.bf16.msra.mxu2 %v91_v22  ;;  %v144_v32 = vld [vmem:[%s248_s6] ss:$0 sm:$0xff] }
   0x8   :  { %50 = vmatpush.bf16.msra.mxu0 %v33_v5 }
   0xa   :  { %78 = vmatpush.bf16.msra.mxu1 %v62_v13 }
   0xb   :  { %139 = vmatmul.msk.bf16.vlgmr.msra.gmra.mxu0 %vm39_vm0, %v28_v7  ;;  %106 = vmatpush.bf16.msra.mxu2 %v90_v25 }
  0x88   :  { %v52_v15 = vpop.f32.mrf.mxu0 }
  0x89   :  { %v53_v16 = vadd.f32 %v142_v14, %v52_v15 }
  0x8b   :  { %v56_v17 = vmax.f32 %v53_v16, 0.0 }
  0x8d   :  { %v57_v18 = vpack.c.bf16 %v56_v17, %v56_v17 }
  0x8f   :  { %140 = vmatmul.msk.bf16.vlgmr.msra.gmra.mxu1 %vm39_vm0, %v57_v18 }
  0x90   :  { %v54_v19 = vpop.f32.mrf.mxu0 }
 0x10c   :  { %v80_v27 = vpop.f32.mrf.mxu1 }
 0x10d   :  { %v81_v28 = vadd.f32 %v143_v26, %v80_v27 }
 0x10f   :  { %v84_v29 = vmax.f32 %v81_v28, 0.0 }
 0x111   :  { %v85_v30 = vpack.c.bf16 %v84_v29, %v84_v29 }
 0x113   :  { %141 = vmatmul.msk.bf16.vlgmr.msra.gmra.mxu2 %vm39_vm0, %v85_v30 }
 0x114   :  { %v82_v31 = vpop.f32.mrf.mxu1 }
 0x196   :  { %v108_v33 = vpop.f32.mrf.mxu2 }
 0x197   :  { %v109_v34 = vadd.f32 %v144_v32, %v108_v33 }
 0x199   :  { %112 = vmax.xlane.f32.xlu0 %v109_v34 }
 0x19e   :  { %v110_v35 = vpop.f32.mrf.mxu2 }
 0x20c   :  { %v113_v36 = vpop.xlane.xlu0 %112 }
 0x20d   :  { %v114_v37 = vsub.f32 %v109_v34, %v113_v36 }
 0x20f   :  { %v115_v38 = vmul.f32 1.442695, %v114_v37 }
 0x211   :  { %145 = vpow2.f32 %v115_v38 }
 0x217   :  { %v146_v39 = vpop.eup %145 }
 0x218   :  { %117 = vadd.xlane.f32.xlu0 %v146_v39 }
 0x28b   :  { %v118_v40 = vpop.xlane.xlu0 %117 }
 0x28c   :  { %147 = vrcp.f32 %v118_v40  ;;  %v130_v44 = vand.u32 2147483648, %v118_v40  ;;  %v128_v46 = vand.u32 2147483647, %v118_v40  ;;  %vm124_vm2 = vweird.f32 %v118_v40 }
 0x28e   :  { %v131_v48 = vor.u32 1.1754944e-38, %v130_v44  ;;  %vm129_vm4 = vcmp.eq.f32.partialorder %v128_v46, 8.507059e+37 }
 0x292   :  { %v148_v41 = vpop.eup %147 }
 0x293   :  { %v120_v42 = vmul.f32 %v148_v41, %v118_v40  ;;  %vm125_vm1 = vweird.f32 %v148_v41 }
 0x294   :  { %vm126_vm3 = vmor %vm124_vm2, %vm125_vm1 }
 0x295   :  { %v121_v43 = vsub.f32 1.0, %v120_v42 }
 0x297   :  { %v122_v45 = vmul.f32 %v148_v41, %v121_v43 }
 0x299   :  { %v123_v47 = vadd.f32 %v148_v41, %v122_v45 }
 0x29b   :  { %v127_v49 = vsel %vm126_vm3, %v148_v41, %v123_v47 }
 0x29c   :  { %v132_v50 = vsel %vm129_vm4, %v131_v48, %v127_v49 }
 0x29d   :  { %v133_v51 = vmul.f32 %v146_v39, %v132_v50 }
 0x29f   :  { %134 = vst [vmem:[%s250_s7] sm:$0xff] %v133_v51 }

</bundles_post_ra>
